<compile_context>
chip_gen: v5e
topology: v5e:2x2
jax: 0.10.0
libtpu: 0.0.40
codegen_flags: <defaults>
</compile_context>

<pallas_src>
import functools

import jax
import jax.numpy as jnp
from jax.experimental import pallas as pl
from jax.experimental.pallas import tpu as pltpu


def basic_block_kernel(x3_ref, xres_ref, m1_ref, b1_ref, m2_ref, b2_ref,
                       out_ref, *, H):
    """One grid step = a block of images stacked along rows (M = NB*H, lane = W*C)."""
    M, WC = out_ref.shape

    # ---- conv1 (+ folded BN1 scale): single (M, 3*WC) x (3*WC, WC) matmul ----
    acc1 = jnp.dot(x3_ref[...], m1_ref[...], preferred_element_type=jnp.float32)
    # BN1 bias + ReLU; dropout(p=0) is the identity.
    h1 = jnp.maximum(acc1 + b1_ref[...], 0.0)

    # ---- conv2 operand: per-image row shifts of h1 (XLU rolls + boundary mask) ----
    row = jax.lax.broadcasted_iota(jnp.int32, (M, 1), 0)
    r_img = row % H                                   # row index within its image
    # h_up[r] = h1[r-1] (kh=0 tap), zero at each image's first row.
    h_up = jnp.where(r_img == 0, 0.0, pltpu.roll(h1, shift=1, axis=0))
    # h_dn[r] = h1[r+1] (kh=2 tap), zero at each image's last row.
    h_dn = jnp.where(r_img == H - 1, 0.0, pltpu.roll(h1, shift=M - 1, axis=0))
    x3b = jnp.concatenate([h_up, h1, h_dn], axis=-1).astype(m2_ref.dtype)

    # ---- conv2 (+ folded BN2 scale), bias, residual, final ReLU ----
    acc2 = jnp.dot(x3b, m2_ref[...], preferred_element_type=jnp.float32)
    out = jnp.maximum(acc2 + b2_ref[...] + xres_ref[...], 0.0)
    out_ref[...] = out.astype(out_ref.dtype)


def pack_conv3x3_banded(w_hwio, W):
    """HWIO (3,3,Ci,Co) conv weight -> (3, W*Ci, W*Co) block-banded matrices.

    M[kh][wi*Ci+ci, wo*Co+co] = w[kh, kw, ci, co] with wi = wo + kw - 1; taps
    outside [0, W) are dropped (zero padding along W).  Built once, host-side.
    """
    _, _, Ci, Co = w_hwio.shape
    M = jnp.zeros((3, W * Ci, W * Co), w_hwio.dtype)
    for wo in range(W):
        for kw in range(3):
            wi = wo + kw - 1
            if 0 <= wi < W:
                M = M.at[:, wi * Ci:(wi + 1) * Ci,
                         wo * Co:(wo + 1) * Co].set(w_hwio[:, kw])
    return M


def basic_block_forward(x_nchw, w1, g1, be1, m1, v1, w2, g2, be2, m2, v2,
                        eps=1e-5, images_per_step=None,
                        matmul_dtype=jnp.bfloat16):
    """Fused BasicBlock forward (eval BN, dropout p=0, stride=1, no downsample)."""
    N, C, H, W = x_nchw.shape
    WC = W * C
    NB = N if images_per_step is None else images_per_step
    assert N % NB == 0, "images_per_step must divide the batch"
    MB = NB * H

    # Fold eval-mode BN into per-channel scale/bias; fold scale into weights.
    s1 = g1 / jnp.sqrt(v1 + eps)
    b1 = be1 - m1 * s1
    s2 = g2 / jnp.sqrt(v2 + eps)
    b2 = be2 - m2 * s2
    w1f = w1 * s1[None, None, None, :]
    w2f = w2 * s2[None, None, None, :]

    # Banded weights, flattened to K = 3*WC; matmul operands in matmul_dtype.
    m1b = pack_conv3x3_banded(w1f, W).reshape(3 * WC, WC).astype(matmul_dtype)
    m2b = pack_conv3x3_banded(w2f, W).reshape(3 * WC, WC).astype(matmul_dtype)
    b1p = jnp.tile(b1, W)[None, :].astype(jnp.float32)   # index w*C+c -> b1[c]
    b2p = jnp.tile(b2, W)[None, :].astype(jnp.float32)

    # NCHW -> lane-dense (N, H, W*C); conv1 operand = shifted-row concat along lanes.
    x_packed = jnp.transpose(x_nchw, (0, 2, 3, 1)).reshape(N, H, WC)
    xpad = jnp.pad(x_packed, ((0, 0), (1, 1), (0, 0)))
    x3 = jnp.concatenate(
        [xpad[:, 0:H], xpad[:, 1:H + 1], xpad[:, 2:H + 2]], axis=-1)
    x3 = x3.reshape(N * H, 3 * WC).astype(matmul_dtype)
    xres = x_packed.reshape(N * H, WC).astype(jnp.float32)

    kernel = functools.partial(basic_block_kernel, H=H)
    out_flat = pl.pallas_call(
        kernel,
        out_shape=jax.ShapeDtypeStruct((N * H, WC), x_nchw.dtype),
        grid=(N // NB,),
        in_specs=[
            pl.BlockSpec((MB, 3 * WC), lambda n: (n, 0)),   # conv1 operand
            pl.BlockSpec((MB, WC), lambda n: (n, 0)),       # residual
            pl.BlockSpec((3 * WC, WC), lambda n: (0, 0)),   # banded w1*s1
            pl.BlockSpec((1, WC), lambda n: (0, 0)),        # bn1 bias
            pl.BlockSpec((3 * WC, WC), lambda n: (0, 0)),   # banded w2*s2
            pl.BlockSpec((1, WC), lambda n: (0, 0)),        # bn2 bias
        ],
        out_specs=pl.BlockSpec((MB, WC), lambda n: (n, 0)),
        compiler_params=pltpu.CompilerParams(
            dimension_semantics=("parallel",),
            vmem_limit_bytes=32 * 1024 * 1024,
        ),
    )(x3, xres, m1b, b1p, m2b, b2p)

    return jnp.transpose(out_flat.reshape(N, H, W, C), (0, 3, 1, 2))


def reference_basic_block(x_nchw, w1, g1, be1, m1, v1, w2, g2, be2, m2, v2,
                          eps=1e-5):
    """Pure-JAX reference (PyTorch eval-mode BasicBlock, downsample=None)."""
    dn = ('NCHW', 'HWIO', 'NCHW')

    def conv(x, w):
        return jax.lax.conv_general_dilated(
            x, w, window_strides=(1, 1), padding=((1, 1), (1, 1)),
            dimension_numbers=dn)

    def bn(y, g, b, m, v):
        s = (g / jnp.sqrt(v + eps))[None, :, None, None]
        return (y - m[None, :, None, None]) * s + b[None, :, None, None]

    out = jnp.maximum(bn(conv(x_nchw, w1), g1, be1, m1, v1), 0.0)
    out = bn(conv(out, w2), g2, be2, m2, v2)
    return jnp.maximum(out + x_nchw, 0.0)


if __name__ == "__main__":
    # inplanes = planes = 8, stride = 1 (module defaults); W*C = 128 exactly.
    N, C, H, W = 2, 8, 16, 16

    key = jax.random.PRNGKey(0)
    ks = jax.random.split(key, 11)
    x = jax.random.normal(ks[0], (N, C, H, W), jnp.float32)

    # conv weights in HWIO (3, 3, Cin, Cout)
    w1 = jax.random.normal(ks[1], (3, 3, C, C), jnp.float32) * 0.1
    w2 = jax.random.normal(ks[2], (3, 3, C, C), jnp.float32) * 0.1

    # eval-mode BatchNorm parameters: gamma, beta, running_mean, running_var
    g1 = jax.random.uniform(ks[3], (C,), jnp.float32, 0.5, 1.5)
    be1 = jax.random.normal(ks[4], (C,), jnp.float32) * 0.1
    m1 = jax.random.normal(ks[5], (C,), jnp.float32) * 0.1
    v1 = jax.random.uniform(ks[6], (C,), jnp.float32, 0.5, 1.5)
    g2 = jax.random.uniform(ks[7], (C,), jnp.float32, 0.5, 1.5)
    be2 = jax.random.normal(ks[8], (C,), jnp.float32) * 0.1
    m2 = jax.random.normal(ks[9], (C,), jnp.float32) * 0.1
    v2 = jax.random.uniform(ks[10], (C,), jnp.float32, 0.5, 1.5)

    ref = jax.block_until_ready(
        reference_basic_block(x, w1, g1, be1, m1, v1, w2, g2, be2, m2, v2))

    # f32 matmul path: strict 1e-4 check against the f32 reference.
    out_f32 = jax.block_until_ready(
        basic_block_forward(x, w1, g1, be1, m1, v1, w2, g2, be2, m2, v2,
                            matmul_dtype=jnp.float32))
    assert out_f32.shape == (N, C, H, W)
    assert jnp.allclose(out_f32, ref, atol=1e-4, rtol=1e-4), \
        f"f32 max abs err = {jnp.max(jnp.abs(out_f32 - ref))}"

    # bf16 matmul path (f32 accumulation): tolerance re-baselined per review.
    out_bf16 = jax.block_until_ready(
        basic_block_forward(x, w1, g1, be1, m1, v1, w2, g2, be2, m2, v2,
                            matmul_dtype=jnp.bfloat16))
    assert out_bf16.shape == (N, C, H, W)
    assert jnp.allclose(out_bf16, ref, atol=2e-2, rtol=2e-2), \
        f"bf16 max abs err = {jnp.max(jnp.abs(out_bf16 - ref))}"

    print("KERNEL_OK")
</pallas_src>

<mosaic_0001>
module attributes {stable_mosaic.version = 11 : i64} {
  func.func @basic_block_kernel(%arg0: i32, %arg1: memref<32x384xf32, #tpu.memory_space<vmem>>, %arg2: memref<32x128xf32, #tpu.memory_space<vmem>>, %arg3: memref<384x128xf32, #tpu.memory_space<vmem>>, %arg4: memref<1x128xf32, #tpu.memory_space<vmem>>, %arg5: memref<384x128xf32, #tpu.memory_space<vmem>>, %arg6: memref<1x128xf32, #tpu.memory_space<vmem>>, %arg7: memref<32x128xf32, #tpu.memory_space<vmem>>) attributes {dimension_semantics = [#tpu.dimension_semantics<parallel>], iteration_bounds = array<i64: 1>, scalar_prefetch = 0 : i64, scratch_operands = 0 : i64, tpu.core_type = #tpu.core_type<tc>, window_params = [{transform_indices = @transform_0, window_bounds = array<i64: 32, 384>}, {transform_indices = @transform_1, window_bounds = array<i64: 32, 128>}, {pipeline_mode = #tpu.pipeline_mode<synchronous>, transform_indices = @transform_2, window_bounds = array<i64: 384, 128>}, {pipeline_mode = #tpu.pipeline_mode<synchronous>, transform_indices = @transform_3, window_bounds = array<i64: 1, 128>}, {pipeline_mode = #tpu.pipeline_mode<synchronous>, transform_indices = @transform_4, window_bounds = array<i64: 384, 128>}, {pipeline_mode = #tpu.pipeline_mode<synchronous>, transform_indices = @transform_5, window_bounds = array<i64: 1, 128>}, {transform_indices = @transform_6, window_bounds = array<i64: 32, 128>}]} {
    %c0 = arith.constant 0 : index
    %c0_0 = arith.constant 0 : index
    %0 = vector.load %arg1[%c0, %c0_0] : memref<32x384xf32, #tpu.memory_space<vmem>>, vector<32x384xf32>
    %c0_1 = arith.constant 0 : index
    %c0_2 = arith.constant 0 : index
    %1 = vector.load %arg3[%c0_1, %c0_2] : memref<384x128xf32, #tpu.memory_space<vmem>>, vector<384x128xf32>
    %cst = arith.constant dense<0.000000e+00> : vector<32x128xf32>
    %2 = tpu.matmul %0, %1, %cst {dimension_numbers = #tpu.dot_dimension_numbers<[1], [0], [0], [1], [0, 0, 1, 1], [], []>} : vector<32x384xf32>, vector<384x128xf32>, vector<32x128xf32> -> vector<32x128xf32>
    %c0_3 = arith.constant 0 : index
    %c0_4 = arith.constant 0 : index
    %3 = vector.load %arg4[%c0_3, %c0_4] : memref<1x128xf32, #tpu.memory_space<vmem>>, vector<1x128xf32>
    %4 = vector.broadcast %3 : vector<1x128xf32> to vector<32x128xf32>
    %5 = arith.addf %2, %4 : vector<32x128xf32>
    %cst_5 = arith.constant 0.000000e+00 : f32
    %6 = vector.broadcast %cst_5 : f32 to vector<32x128xf32>
    %7 = arith.maximumf %5, %6 : vector<32x128xf32>
    %8 = tpu.iota {dimensions = array<i32: 0>} : vector<32x1xi32>
    %c16_i32 = arith.constant 16 : i32
    %c0_i32 = arith.constant 0 : i32
    %9 = arith.cmpi eq, %c16_i32, %c0_i32 : i32
    %c1_i32 = arith.constant 1 : i32
    %10 = arith.select %9, %c1_i32, %c16_i32 : i32
    %11 = vector.broadcast %10 : i32 to vector<32x1xi32>
    %12 = arith.remsi %8, %11 : vector<32x1xi32>
    %c0_i32_6 = arith.constant 0 : i32
    %13 = vector.broadcast %c0_i32_6 : i32 to vector<32x1xi32>
    %14 = arith.cmpi ne, %12, %13 : vector<32x1xi32>
    %c0_i32_7 = arith.constant 0 : i32
    %15 = vector.broadcast %c0_i32_7 : i32 to vector<32x1xi32>
    %16 = arith.cmpi slt, %12, %15 : vector<32x1xi32>
    %c0_i32_8 = arith.constant 0 : i32
    %17 = arith.cmpi slt, %10, %c0_i32_8 : i32
    %18 = vector.broadcast %17 : i1 to vector<32x1xi1>
    %19 = vector.broadcast %18 : vector<32x1xi1> to vector<32x1xi1>
    %20 = arith.xori %16, %19 : vector<32x1xi1>
    %21 = arith.andi %20, %14 : vector<32x1xi1>
    %22 = vector.broadcast %10 : i32 to vector<32x1xi32>
    %23 = arith.addi %12, %22 : vector<32x1xi32>
    %24 = arith.select %21, %23, %12 : vector<32x1xi1>, vector<32x1xi32>
    %c0_i32_9 = arith.constant 0 : i32
    %25 = vector.broadcast %c0_i32_9 : i32 to vector<32x1xi32>
    %26 = arith.cmpi eq, %24, %25 : vector<32x1xi32>
    %c1_i32_10 = arith.constant 1 : i32
    %27 = tpu.dynamic_rotate %7 by %c1_i32_10 dim 0 : vector<32x128xf32>, i32 -> vector<32x128xf32>
    %cst_11 = arith.constant 0.000000e+00 : f32
    %28 = vector.shape_cast %26 : vector<32x1xi1> to vector<32x1xi1>
    %29 = vector.broadcast %28 : vector<32x1xi1> to vector<32x128xi1>
    %30 = vector.broadcast %cst_11 : f32 to vector<32x128xf32>
    %31 = arith.select %29, %30, %27 : vector<32x128xi1>, vector<32x128xf32>
    %c15_i32 = arith.constant 15 : i32
    %32 = vector.broadcast %c15_i32 : i32 to vector<32x1xi32>
    %33 = arith.cmpi eq, %24, %32 : vector<32x1xi32>
    %c31_i32 = arith.constant 31 : i32
    %34 = tpu.dynamic_rotate %7 by %c31_i32 dim 0 : vector<32x128xf32>, i32 -> vector<32x128xf32>
    %cst_12 = arith.constant 0.000000e+00 : f32
    %35 = vector.shape_cast %33 : vector<32x1xi1> to vector<32x1xi1>
    %36 = vector.broadcast %35 : vector<32x1xi1> to vector<32x128xi1>
    %37 = vector.broadcast %cst_12 : f32 to vector<32x128xf32>
    %38 = arith.select %36, %37, %34 : vector<32x128xi1>, vector<32x128xf32>
    %39 = tpu.concatenate %31, %7, %38 in 1 : vector<32x128xf32>, vector<32x128xf32>, vector<32x128xf32> -> vector<32x384xf32>
    %c0_13 = arith.constant 0 : index
    %c0_14 = arith.constant 0 : index
    %40 = vector.load %arg5[%c0_13, %c0_14] : memref<384x128xf32, #tpu.memory_space<vmem>>, vector<384x128xf32>
    %cst_15 = arith.constant dense<0.000000e+00> : vector<32x128xf32>
    %41 = tpu.matmul %39, %40, %cst_15 {dimension_numbers = #tpu.dot_dimension_numbers<[1], [0], [0], [1], [0, 0, 1, 1], [], []>} : vector<32x384xf32>, vector<384x128xf32>, vector<32x128xf32> -> vector<32x128xf32>
    %c0_16 = arith.constant 0 : index
    %c0_17 = arith.constant 0 : index
    %42 = vector.load %arg6[%c0_16, %c0_17] : memref<1x128xf32, #tpu.memory_space<vmem>>, vector<1x128xf32>
    %43 = vector.broadcast %42 : vector<1x128xf32> to vector<32x128xf32>
    %44 = arith.addf %41, %43 : vector<32x128xf32>
    %c0_18 = arith.constant 0 : index
    %c0_19 = arith.constant 0 : index
    %45 = vector.load %arg2[%c0_18, %c0_19] : memref<32x128xf32, #tpu.memory_space<vmem>>, vector<32x128xf32>
    %46 = arith.addf %44, %45 : vector<32x128xf32>
    %cst_20 = arith.constant 0.000000e+00 : f32
    %47 = vector.broadcast %cst_20 : f32 to vector<32x128xf32>
    %48 = arith.maximumf %46, %47 : vector<32x128xf32>
    %c0_21 = arith.constant 0 : index
    %c0_22 = arith.constant 0 : index
    %49 = vector.load %arg7[%c0_21, %c0_22] : memref<32x128xf32, #tpu.memory_space<vmem>>, vector<32x128xf32>
    tpu.vector_store %arg7[%c0_21, %c0_22], %48 {strides = array<i32>} : memref<32x128xf32, #tpu.memory_space<vmem>>, vector<32x128xf32>,
    return
  }
  func.func @transform_0(%arg0: i32) -> (i32, i32) {
    %c0_i32 = arith.constant 0 : i32
    %c0_i32_0 = arith.constant 0 : i32
    return %arg0, %c0_i32 : i32, i32
  }
  func.func @transform_1(%arg0: i32) -> (i32, i32) {
    %c0_i32 = arith.constant 0 : i32
    %c0_i32_0 = arith.constant 0 : i32
    return %arg0, %c0_i32 : i32, i32
  }
  func.func @transform_2(%arg0: i32) -> (i32, i32) {
    %c0_i32 = arith.constant 0 : i32
    %c0_i32_0 = arith.constant 0 : i32
    %c0_i32_1 = arith.constant 0 : i32
    return %c0_i32, %c0_i32_0 : i32, i32
  }
  func.func @transform_3(%arg0: i32) -> (i32, i32) {
    %c0_i32 = arith.constant 0 : i32
    %c0_i32_0 = arith.constant 0 : i32
    %c0_i32_1 = arith.constant 0 : i32
    return %c0_i32, %c0_i32_0 : i32, i32
  }
  func.func @transform_4(%arg0: i32) -> (i32, i32) {
    %c0_i32 = arith.constant 0 : i32
    %c0_i32_0 = arith.constant 0 : i32
    %c0_i32_1 = arith.constant 0 : i32
    return %c0_i32, %c0_i32_0 : i32, i32
  }
  func.func @transform_5(%arg0: i32) -> (i32, i32) {
    %c0_i32 = arith.constant 0 : i32
    %c0_i32_0 = arith.constant 0 : i32
    %c0_i32_1 = arith.constant 0 : i32
    return %c0_i32, %c0_i32_0 : i32, i32
  }
  func.func @transform_6(%arg0: i32) -> (i32, i32) {
    %c0_i32 = arith.constant 0 : i32
    %c0_i32_0 = arith.constant 0 : i32
    return %arg0, %c0_i32 : i32, i32
  }
}

</mosaic_0001>

<bundles_post_ra>
// kernel: tpu_custom_call.1
= control target key start
LH: loop header
LB: loop body
LE: loop exit
PB: predicated region body
PF: predicated region fallthrough
CT: control target
= control target key end

     0   :  { %11 = vsyncpa [#allocation3], 0  ;;  %s866_s0 = inlined_call_operand.hbm [shape: f32[32,384], index: 0, kind: input, shape index: {}]   ;;  %s867_s1 = inlined_call_operand.hbm [shape: f32[32,128], index: 1, kind: input, shape index: {}]   ;;  %s868_s2 = inlined_call_operand.hbm [shape: f32[384,128], index: 2, kind: input, shape index: {}]   ;;  %s869_s3 = inlined_call_operand.vmem [shape: f32[1,128], index: 3, kind: input, shape index: {}]   ;;  %s870_s4 = inlined_call_operand.hbm [shape: f32[384,128], index: 4, kind: input, shape index: {}]   ;;  %s871_s5 = inlined_call_operand.vmem [shape: f32[1,128], index: 5, kind: input, shape index: {}]   ;;  %s872_s6 = inlined_call_operand.hbm [shape: f32[32,128], index: 6, kind: output, shape index: {}]  }
   0x1   :  { %12 = vsyncpa [#allocation6], 0 }
   0x2   :  { %13 = vsyncpa [#allocation9], 0  ;;  %s32_s23 = sshll.u32 %s867_s1, 4  ;;  %s33_s23 = int_to_ptr.hbm [resolvable:$true] %s32_s23 }
   0x3   :  { %14 = vsyncpa [#allocation4], 0  ;;  %s704_s24 = smov [#allocation5]   ;;  %s19_s28 = sshll.u32 %s866_s0, 4  ;;  %s20_s28 = int_to_ptr.hbm [resolvable:$true] %s19_s28 }
   0x4   :  { %s34_s25 = sshll.u32 %s704_s24, 4  ;;  %s705_s29 = smov 128   ;;  %s35_s25 = int_to_ptr.vmem [resolvable:$true] %s34_s25 }
   0x5   :  { %s706_s30 = smov 8   ;;  %s707_s7 = smov [#allocation2]  }
   0x6   :  { %40 = dma.hbm_to_vmem [thread:$0]  %s33_s23, 512, %s35_s25, [#allocation6], %s705_s29, %s705_s29, %s706_s30  }
   0x7   :  { %s21_s8 = sshll.u32 %s707_s7, 4  ;;  %s708_s1 = smov 384   ;;  %s22_s8 = int_to_ptr.vmem [resolvable:$true] %s21_s8 }
   0x8   :  { %s709_s9 = smov 24   ;;  %s45_s12 = sshll.u32 %s868_s2, 4  ;;  %s46_s12 = int_to_ptr.hbm [resolvable:$true] %s45_s12 }
   0x9   :  { %27 = dma.hbm_to_vmem [thread:$0]  %s20_s28, 1536, %s22_s8, [#allocation3], %s708_s1, %s708_s1, %s709_s9  }
   0xa   :  { %s710_s13 = smov [#allocation7]   ;;  %s60_s16 = sshll.u32 %s870_s4, 4  ;;  %s61_s16 = int_to_ptr.hbm [resolvable:$true] %s60_s16 }
   0xb   :  { %s47_s0 = sshll.u32 %s710_s13, 4  ;;  %s711_s17 = smov [#allocation8]   ;;  %s48_s0 = int_to_ptr.vmem [resolvable:$true] %s47_s0 }
   0xc   :  { %53 = dma.hbm_to_vmem [thread:$0]  %s46_s12, 6144, %s48_s0, [#allocation6], %s705_s29, %s705_s29, %s706_s30  }
   0xd   :  { %s62_s18 = sshll.u32 %s711_s17, 4  ;;  %s63_s18 = int_to_ptr.vmem [resolvable:$true] %s62_s18 }
   0xe   :  { %68 = dma.hbm_to_vmem [thread:$0]  %s61_s16, 6144, %s63_s18, [#allocation9], %s705_s29, %s705_s29, %s706_s30  }
   0xf   :  { %696 = dma.done.wait [#allocation3], 1536  }
  0x10   :  { %697 = vsyncadd [#allocation3], 4294965760 }
  0x11   :  { %698 = dma.done.wait [#allocation6], 6656  }
  0x12   :  { %699 = vsyncadd [#allocation6], 4294960640 }
  0x13   :  { %700 = dma.done.wait [#allocation9], 6144  }
  0x14   :  { %701 = vsyncadd [#allocation9], 4294961152  ;;  %v146_v0 = vld [vmem:[#allocation7 + $0x178] sm:$0xff]  ;;  %v145_v2 = vld [vmem:[#allocation7 + $0x170] sm:$0xff]  ;;  %s506_s23 = sshll.u32 %s872_s6, 4  ;;  %s507_s23 = int_to_ptr.hbm [resolvable:$true] %s506_s23 }
  0x15   :  { %v114_v1 = vld [vmem:[#allocation7 + $0x78] sm:$0xff]  ;;  %209 = vmatpush.msra.mxu2 %v146_v0  ;;  %v113_v3 = vld [vmem:[#allocation7 + $0x70] sm:$0xff]  ;;  %v144_v5 = vld [vmem:[#allocation7 + $0x168] sm:$0xff] }
  0x16   :  { %151 = vmatpush.msra.mxu0 %v114_v1  ;;  %v130_v4 = vld [vmem:[#allocation7 + $0xf8] sm:$0xff]  ;;  %v112_v6 = vld [vmem:[#allocation7 + $0x68] sm:$0xff]  ;;  %v129_v7 = vld [vmem:[#allocation7 + $0xf0] sm:$0xff] }
  0x17   :  { %180 = vmatpush.msra.mxu1 %v130_v4  ;;  %210 = vmatpush.msra.mxu2 %v145_v2  ;;  %v128_v8 = vld [vmem:[#allocation7 + $0xe8] sm:$0xff]  ;;  %v143_v9 = vld [vmem:[#allocation7 + $0x160] sm:$0xff]  ;;  %v142_v12 = vld [vmem:[#allocation7 + $0x158] sm:$0xff] }
  0x18   :  { %152 = vmatpush.msra.mxu0 %v113_v3  ;;  %v111_v10 = vld [vmem:[#allocation7 + $0x60] sm:$0xff]  ;;  %v110_v13 = vld [vmem:[#allocation7 + $0x58] sm:$0xff]  ;;  %v141_v15 = vld [vmem:[#allocation7 + $0x150] sm:$0xff] }
  0x19   :  { %181 = vmatpush.msra.mxu1 %v129_v7  ;;  %211 = vmatpush.msra.mxu2 %v144_v5  ;;  %v127_v11 = vld [vmem:[#allocation7 + $0xe0] sm:$0xff]  ;;  %v126_v14 = vld [vmem:[#allocation7 + $0xd8] sm:$0xff]  ;;  %v109_v16 = vld [vmem:[#allocation7 + $0x50] sm:$0xff] }
  0x1a   :  { %153 = vmatpush.msra.mxu0 %v112_v6  ;;  %v125_v17 = vld [vmem:[#allocation7 + $0xd0] sm:$0xff]  ;;  %v140_v18 = vld [vmem:[#allocation7 + $0x148] sm:$0xff]  ;;  %v139_v21 = vld [vmem:[#allocation7 + $0x140] sm:$0xff] }
  0x1b   :  { %182 = vmatpush.msra.mxu1 %v128_v8  ;;  %212 = vmatpush.msra.mxu2 %v143_v9  ;;  %v108_v19 = vld [vmem:[#allocation7 + $0x48] sm:$0xff]  ;;  %v107_v22 = vld [vmem:[#allocation7 + $0x40] sm:$0xff]  ;;  %v138_v24 = vld [vmem:[#allocation7 + $0x138] sm:$0xff] }
  0x1c   :  { %154 = vmatpush.msra.mxu0 %v111_v10  ;;  %v124_v20 = vld [vmem:[#allocation7 + $0xc8] sm:$0xff]  ;;  %v123_v23 = vld [vmem:[#allocation7 + $0xc0] sm:$0xff]  ;;  %v106_v25 = vld [vmem:[#allocation7 + $0x38] sm:$0xff] }
  0x1d   :  { %183 = vmatpush.msra.mxu1 %v127_v11  ;;  %213 = vmatpush.msra.mxu2 %v142_v12  ;;  %v122_v26 = vld [vmem:[#allocation7 + $0xb8] sm:$0xff]  ;;  %v137_v27 = vld [vmem:[#allocation7 + $0x130] sm:$0xff]  ;;  %v136_v30 = vld [vmem:[#allocation7 + $0x128] sm:$0xff] }
  0x1e   :  { %155 = vmatpush.msra.mxu0 %v110_v13  ;;  %v105_v28 = vld [vmem:[#allocation7 + $0x30] sm:$0xff]  ;;  %v104_v31 = vld [vmem:[#allocation7 + $0x28] sm:$0xff]  ;;  %v135_v33 = vld [vmem:[#allocation7 + $0x120] sm:$0xff] }
  0x1f   :  { %184 = vmatpush.msra.mxu1 %v126_v14  ;;  %214 = vmatpush.msra.mxu2 %v141_v15  ;;  %v121_v29 = vld [vmem:[#allocation7 + $0xb0] sm:$0xff]  ;;  %v120_v32 = vld [vmem:[#allocation7 + $0xa8] sm:$0xff]  ;;  %v103_v34 = vld [vmem:[#allocation7 + $0x20] sm:$0xff] }
  0x20   :  { %156 = vmatpush.msra.mxu0 %v109_v16  ;;  %v119_v35 = vld [vmem:[#allocation7 + $0xa0] sm:$0xff]  ;;  %v134_v36 = vld [vmem:[#allocation7 + $0x118] sm:$0xff]  ;;  %v133_v39 = vld [vmem:[#allocation7 + $0x110] sm:$0xff] }
  0x21   :  { %185 = vmatpush.msra.mxu1 %v125_v17  ;;  %215 = vmatpush.msra.mxu2 %v140_v18  ;;  %v102_v37 = vld [vmem:[#allocation7 + $0x18] sm:$0xff]  ;;  %v101_v40 = vld [vmem:[#allocation7 + $0x10] sm:$0xff]  ;;  %v132_v42 = vld [vmem:[#allocation7 + $0x108] sm:$0xff] }
  0x22   :  { %157 = vmatpush.msra.mxu0 %v108_v19  ;;  %v118_v38 = vld [vmem:[#allocation7 + $0x98] sm:$0xff]  ;;  %v117_v41 = vld [vmem:[#allocation7 + $0x90] sm:$0xff]  ;;  %v100_v43 = vld [vmem:[#allocation7 + $0x8] sm:$0xff] }
  0x23   :  { %186 = vmatpush.msra.mxu1 %v124_v20  ;;  %216 = vmatpush.msra.mxu2 %v139_v21  ;;  %v116_v44 = vld [vmem:[#allocation7 + $0x88] sm:$0xff]  ;;  %v131_v45 = vld [vmem:[#allocation7 + $0x100] sm:$0xff]  ;;  %v89_v47 = vld [vmem:[#allocation2 + $0x10] sm:$0xff] }
  0x24   :  { %158 = vmatpush.msra.mxu0 %v107_v22  ;;  %v99_v46 = vld [vmem:[#allocation7] sm:$0xff]  ;;  %v376_v50 = vld [vmem:[#allocation8 + $0xf8] sm:$0xff]  ;;  %v88_v51 = vld [vmem:[#allocation2 + $0x8] sm:$0xff] }
  0x25   :  { %187 = vmatpush.msra.mxu1 %v123_v23  ;;  %217 = vmatpush.msra.mxu2 %v138_v24  ;;  %v87_v48 = vld [vmem:[#allocation2] sm:$0xff]  ;;  %v375_v52 = vld [vmem:[#allocation8 + $0xf0] sm:$0xff]  ;;  %v769_v53 = vld [vmem:[#allocation8 + $0x178] sm:$0xff] }
  0x26   :  { %159 = vmatpush.msra.mxu0 %v106_v25  ;;  %v115_v49 = vld [vmem:[#allocation7 + $0x80] sm:$0xff]  ;;  %v374_v54 = vld [vmem:[#allocation8 + $0xe8] sm:$0xff]  ;;  %v771_v55 = vld [vmem:[#allocation8 + $0x170] sm:$0xff] }
  0x27   :  { %188 = vmatpush.msra.mxu1 %v122_v26  ;;  %218 = vmatpush.msra.mxu2 %v137_v27  ;;  %v373_v56 = vld [vmem:[#allocation8 + $0xe0] sm:$0xff]  ;;  %v774_v57 = vld [vmem:[#allocation8 + $0x168] sm:$0xff]  ;;  %v90_v59 = vld [vmem:[#allocation2 + $0x18] sm:$0xff] }
  0x28   :  { %160 = vmatpush.msra.mxu0 %v105_v28  ;;  %v92_v58 = vld [vmem:[#allocation2 + $0x28] sm:$0xff]  ;;  %v372_v60 = vld [vmem:[#allocation8 + $0xd8] sm:$0xff]  ;;  %v777_v61 = vld [vmem:[#allocation8 + $0x160] sm:$0xff] }
  0x29   :  { %189 = vmatpush.msra.mxu1 %v121_v29  ;;  %219 = vmatpush.msra.mxu2 %v136_v30  ;;  %v91_v62 = vld [vmem:[#allocation2 + $0x20] sm:$0xff]  ;;  %v371_v63 = vld [vmem:[#allocation8 + $0xd0] sm:$0xff]  ;;  %v780_v0 = vld [vmem:[#allocation8 + $0x158] sm:$0xff] }
  0x2a   :  { %161 = vmatpush.msra.mxu0 %v104_v31  ;;  %v370_v1 = vld [vmem:[#allocation8 + $0xc8] sm:$0xff]  ;;  %v783_v2 = vld [vmem:[#allocation8 + $0x150] sm:$0xff]  ;;  %v369_v3 = vld [vmem:[#allocation8 + $0xc0] sm:$0xff] }
  0x2b   :  { %190 = vmatpush.msra.mxu1 %v120_v32  ;;  %220 = vmatpush.msra.mxu2 %v135_v33  ;;  %v95_v4 = vld [vmem:[#allocation2 + $0x40] sm:$0xff]  ;;  %v93_v5 = vld [vmem:[#allocation2 + $0x30] sm:$0xff]  ;;  %v368_v6 = vld [vmem:[#allocation8 + $0xb8] sm:$0xff] }
  0x2c   :  { %162 = vmatpush.msra.mxu0 %v103_v34  ;;  %v94_v7 = vld [vmem:[#allocation2 + $0x38] sm:$0xff]  ;;  %v367_v8 = vld [vmem:[#allocation8 + $0xb0] sm:$0xff]  ;;  %v366_v9 = vld [vmem:[#allocation8 + $0xa8] sm:$0xff] }
  0x2d   :  { %191 = vmatpush.msra.mxu1 %v119_v35  ;;  %221 = vmatpush.msra.mxu2 %v134_v36  ;;  %v98_v10 = vld [vmem:[#allocation2 + $0x58] sm:$0xff]  ;;  %v96_v11 = vld [vmem:[#allocation2 + $0x48] sm:$0xff]  ;;  %v97_v12 = vld [vmem:[#allocation2 + $0x50] sm:$0xff] }
  0x2e   :  { %163 = vmatpush.msra.mxu0 %v102_v37  ;;  %v365_v13 = vld [vmem:[#allocation8 + $0xa0] sm:$0xff]  ;;  %v787_v14 = vld [vmem:[#allocation8 + $0x148] sm:$0xff]  ;;  %v364_v15 = vld [vmem:[#allocation8 + $0x98] sm:$0xff] }
  0x2f   :  { %192 = vmatpush.msra.mxu1 %v118_v38  ;;  %222 = vmatpush.msra.mxu2 %v133_v39  ;;  %v790_v16 = vld [vmem:[#allocation8 + $0x140] sm:$0xff]  ;;  %v363_v17 = vld [vmem:[#allocation8 + $0x90] sm:$0xff]  ;;  %v360_v18 = vld [vmem:[#allocation8 + $0x78] sm:$0xff] }
  0x30   :  { %164 = vmatpush.msra.mxu0 %v101_v40  ;;  %v793_v19 = vld [vmem:[#allocation8 + $0x138] sm:$0xff]  ;;  %397 = vmatpush.msra.mxu3 %v360_v18  ;;  %v362_v20 = vld [vmem:[#allocation8 + $0x88] sm:$0xff]  ;;  %v359_v21 = vld [vmem:[#allocation8 + $0x70] sm:$0xff] }
  0x31   :  { %193 = vmatpush.msra.mxu1 %v117_v41  ;;  %223 = vmatpush.msra.mxu2 %v132_v42  ;;  %v796_v22 = vld [vmem:[#allocation8 + $0x130] sm:$0xff]  ;;  %v361_v23 = vld [vmem:[#allocation8 + $0x80] sm:$0xff]  ;;  %v358_v24 = vld [vmem:[#allocation8 + $0x68] sm:$0xff] }
  0x32   :  { %165 = vmatpush.msra.mxu0 %v100_v43  ;;  %398 = vmatpush.msra.mxu3 %v359_v21  ;;  %v799_v25 = vld [vmem:[#allocation8 + $0x128] sm:$0xff]  ;;  %v357_v26 = vld [vmem:[#allocation8 + $0x60] sm:$0xff]  ;;  %v356_v28 = vld [vmem:[#allocation8 + $0x58] sm:$0xff] }
  0x33   :  { %194 = vmatpush.msra.mxu1 %v116_v44  ;;  %224 = vmatpush.msra.mxu2 %v131_v45  ;;  %v802_v27 = vld [vmem:[#allocation8 + $0x120] sm:$0xff]  ;;  %v805_v29 = vld [vmem:[#allocation8 + $0x118] sm:$0xff]  ;;  %v355_v30 = vld [vmem:[#allocation8 + $0x50] sm:$0xff] }
  0x34   :  { %166 = vmatpush.msra.mxu0 %v99_v46  ;;  %225 = vmatmul.f32.vlgmr.msra.gmra.mxu2 %v89_v47  ;;  %v808_v31 = vld [vmem:[#allocation8 + $0x110] sm:$0xff]  ;;  %v354_v32 = vld [vmem:[#allocation8 + $0x48] sm:$0xff]  ;;  %v353_v34 = vld [vmem:[#allocation8 + $0x40] sm:$0xff] }
  0x35   :  { %167 = vmatmul.f32.vlgmr.msra.gmra.mxu0 %v87_v48  ;;  %195 = vmatpush.msra.mxu1 %v115_v49  ;;  %v811_v33 = vld [vmem:[#allocation8 + $0x108] sm:$0xff]  ;;  %v814_v35 = vld [vmem:[#allocation8 + $0x100] sm:$0xff]  ;;  %v352_v36 = vld [vmem:[#allocation8 + $0x38] sm:$0xff] }
  0x36   :  { %426 = vmatpush.msrb.mxu0 %v376_v50  ;;  %196 = vmatmul.f32.vlgmr.msra.gmra.mxu1 %v88_v51  ;;  %v351_v37 = vld [vmem:[#allocation8 + $0x30] sm:$0xff]  ;;  %v350_v38 = vld [vmem:[#allocation8 + $0x28] sm:$0xff]  ;;  %v349_v39 = vld [vmem:[#allocation8 + $0x20] sm:$0xff] }
  0x37   :  { %533 = vmatpush.msrb.mxu2 %v376_v50  ;;  %455 = vmatpush.msrb.mxu1 %v769_v53  ;;  %v574_v40 = vld [vmem:[%s869_s3] ss:$0 sm:$0xff]  ;;  %v348_v41 = vld [vmem:[#allocation8 + $0x18] sm:$0xff]  ;;  %v347_v43 = vld [vmem:[#allocation8 + $0x10] sm:$0xff] }
  0x38   :  { %427 = vmatpush.msrb.mxu0 %v375_v52  ;;  %399 = vmatpush.msra.mxu3 %v358_v24  ;;  %v346_v46 = vld [vmem:[#allocation8 + $0x8] sm:$0xff]  ;;  %v345_v48 = vld [vmem:[#allocation8] sm:$0xff] }
  0x39   :  { %534 = vmatpush.msrb.mxu2 %v375_v52  ;;  %456 = vmatpush.msrb.mxu1 %v771_v55 }
  0x3a   :  { %428 = vmatpush.msrb.mxu0 %v374_v54  ;;  %400 = vmatpush.msra.mxu3 %v357_v26 }
  0x3b   :  { %535 = vmatpush.msrb.mxu2 %v374_v54  ;;  %457 = vmatpush.msrb.mxu1 %v774_v57 }
  0x3c   :  { %429 = vmatpush.msrb.mxu0 %v373_v56  ;;  %228 = vmatmul.f32.gmra.mxu2 %v92_v58  ;;  %v242_v58 = vlaneseq }
  0x3d   :  { %170 = vmatmul.f32.gmra.mxu0 %v90_v59  ;;  %458 = vmatpush.msrb.mxu1 %v777_v61 }
  0x3e   :  { %430 = vmatpush.msrb.mxu0 %v372_v60  ;;  %199 = vmatmul.f32.gmra.mxu1 %v91_v62  ;;  %v827_v62 = vshrl.u32 %v242_v58, 7 }
  0x3f   :  { %536 = vmatpush.msrb.mxu2 %v373_v56  ;;  %459 = vmatpush.msrb.mxu1 %v780_v0 }
  0x40   :  { %431 = vmatpush.msrb.mxu0 %v371_v63  ;;  %401 = vmatpush.msra.mxu3 %v356_v28  ;;  %vm328_vm0 = vcmp.lt.s32.totalorder %v827_v62, 7  ;;  %vm303_vm3 = vcmp.lt.s32.totalorder %v827_v62, 1 }
  0x41   :  { %537 = vmatpush.msrb.mxu2 %v372_v60  ;;  %460 = vmatpush.msrb.mxu1 %v783_v2 }
  0x42   :  { %432 = vmatpush.msrb.mxu0 %v370_v1  ;;  %402 = vmatpush.msra.mxu3 %v355_v30  ;;  %v246_v30 = vadd.s32 24, %v827_v62 }
  0x43   :  { %538 = vmatpush.msrb.mxu2 %v371_v63  ;;  %461 = vmatpush.msrb.mxu1 %v787_v14 }
  0x44   :  { %433 = vmatpush.msrb.mxu0 %v369_v3  ;;  %231 = vmatmul.f32.gmra.mxu2 %v95_v4 }
  0x45   :  { %173 = vmatmul.f32.gmra.mxu0 %v93_v5  ;;  %539 = vmatpush.msrb.mxu2 %v370_v1  ;;  %v244_v5 = vadd.s32 8, %v827_v62 }
  0x46   :  { %434 = vmatpush.msrb.mxu0 %v368_v6  ;;  %202 = vmatmul.f32.gmra.mxu1 %v94_v7 }
  0x47   :  { %540 = vmatpush.msrb.mxu2 %v369_v3  ;;  %462 = vmatpush.msrb.mxu1 %v790_v16  ;;  %v258_v7 = vand.u32 15, %v244_v5  ;;  %v487_v5 = vld [vmem:[#allocation5 + $0x18] sm:$0xff] }
  0x48   :  { %435 = vmatpush.msrb.mxu0 %v367_v8  ;;  %403 = vmatpush.msra.mxu3 %v354_v32  ;;  %v272_v32 = vand.u32 15, %v246_v30 }
  0x49   :  { %541 = vmatpush.msrb.mxu2 %v368_v6  ;;  %463 = vmatpush.msrb.mxu1 %v793_v19  ;;  %vm531_vm1 = vcmp.ne.s32.totalorder %v258_v7, 15 }
  0x4a   :  { %436 = vmatpush.msrb.mxu0 %v366_v9  ;;  %404 = vmatpush.msra.mxu3 %v353_v34  ;;  %vm532_vm5 = vcmp.ne.s32.totalorder %v272_v32, 15  ;;  %v575_v34 = vld [vmem:[%s871_s5] ss:$0 sm:$0xff]  ;;  %s712_s5 = smov [#allocation10]  }
  0x4b   :  { %542 = vmatpush.msrb.mxu2 %v367_v8  ;;  %464 = vmatpush.msrb.mxu1 %v796_v22  ;;  %s504_s20 = sshll.u32 %s712_s5, 4  ;;  %s505_s20 = int_to_ptr.vmem [resolvable:$true] %s504_s20 }
  0x4c   :  { %234 = vmatmul.f32.gmra.mxu2 %v98_v10  ;;  %437 = vmatpush.msrb.mxu0 %v365_v13 }
  0x4d   :  { %176 = vmatmul.f32.gmra.mxu0 %v96_v11  ;;  %543 = vmatpush.msrb.mxu2 %v366_v9 }
  0x4e   :  { %205 = vmatmul.f32.gmra.mxu1 %v97_v12  ;;  %438 = vmatpush.msrb.mxu0 %v364_v15 }
  0x4f   :  { %544 = vmatpush.msrb.mxu2 %v365_v13  ;;  %465 = vmatpush.msrb.mxu1 %v799_v25 }
  0x50   :  { %439 = vmatpush.msrb.mxu0 %v363_v17  ;;  %405 = vmatpush.msra.mxu3 %v352_v36 }
  0x51   :  { %545 = vmatpush.msrb.mxu2 %v364_v15  ;;  %466 = vmatpush.msrb.mxu1 %v802_v27 }
  0x52   :  { %440 = vmatpush.msrb.mxu0 %v362_v20  ;;  %406 = vmatpush.msra.mxu3 %v351_v37 }
  0x53   :  { %546 = vmatpush.msrb.mxu2 %v363_v17  ;;  %467 = vmatpush.msrb.mxu1 %v805_v29  ;;  %v251_v17 = vand.u32 15, %v827_v62 }
  0x54   :  { %441 = vmatpush.msrb.mxu0 %v361_v23  ;;  %407 = vmatpush.msra.mxu3 %v350_v38 }
  0x55   :  { %547 = vmatpush.msrb.mxu2 %v362_v20  ;;  %468 = vmatpush.msrb.mxu1 %v808_v31  ;;  %vm529_vm2 = vcmp.ne.s32.totalorder %v251_v17, 0 }
  0x56   :  { %408 = vmatpush.msra.mxu3 %v349_v39 }
  0x57   :  { %548 = vmatpush.msrb.mxu2 %v361_v23  ;;  %469 = vmatpush.msrb.mxu1 %v811_v33  ;;  %v245_v23 = vadd.s32 16, %v827_v62 }
  0x58   :  { %409 = vmatpush.msra.mxu3 %v348_v41 }
  0x59   :  { %470 = vmatpush.msrb.mxu1 %v814_v35 }
  0x5a   :  { %410 = vmatpush.msra.mxu3 %v347_v43 }
  0x5c   :  { %411 = vmatpush.msra.mxu3 %v346_v46 }
  0x5e   :  { %412 = vmatpush.msra.mxu3 %v345_v48 }
  0x60   :  { %549 = vmatpush.msrb.mxu3 %v769_v53 }
  0x62   :  { %550 = vmatpush.msrb.mxu3 %v771_v55 }
  0x64   :  { %551 = vmatpush.msrb.mxu3 %v774_v57 }
  0x66   :  { %552 = vmatpush.msrb.mxu3 %v777_v61 }
  0x68   :  { %553 = vmatpush.msrb.mxu3 %v780_v0 }
  0x6a   :  { %554 = vmatpush.msrb.mxu3 %v783_v2 }
  0x6c   :  { %555 = vmatpush.msrb.mxu3 %v787_v14 }
  0x6e   :  { %556 = vmatpush.msrb.mxu3 %v790_v16 }
  0x70   :  { %557 = vmatpush.msrb.mxu3 %v793_v19 }
  0x72   :  { %558 = vmatpush.msrb.mxu3 %v796_v22 }
  0x74   :  { %559 = vmatpush.msrb.mxu3 %v799_v25  ;;  %v265_v25 = vand.u32 15, %v245_v23 }
  0x76   :  { %560 = vmatpush.msrb.mxu3 %v802_v27  ;;  %vm530_vm4 = vcmp.ne.s32.totalorder %v265_v25, 0 }
  0x78   :  { %561 = vmatpush.msrb.mxu3 %v805_v29 }
  0x7a   :  { %562 = vmatpush.msrb.mxu3 %v808_v31 }
  0x7c   :  { %563 = vmatpush.msrb.mxu3 %v811_v33 }
  0x7e   :  { %564 = vmatpush.msrb.mxu3 %v814_v35 }
  0xb2   :  { %v168_v42 = vpop.f32.mrf.mxu0 }
  0xb3   :  { %v169_v44 = vadd.f32 %v574_v40, %v168_v42  ;;  %v197_v45 = vpop.f32.mrf.mxu1 }
  0xb5   :  { %v198_v47 = vadd.f32 %v197_v45, %v169_v44 }
  0xb7   :  { %v226_v49 = vpop.f32.mrf.mxu2 }
  0xb8   :  { %v227_v50 = vadd.f32 %v226_v49, %v198_v47  ;;  %v485_v49 = vld [vmem:[#allocation5 + $0x8] sm:$0xff] }
  0xba   :  { %v171_v51 = vpop.f32.mrf.mxu0  ;;  %v822_v52 = vmax.f32 %v227_v50, 0.0 }
  0xbb   :  { %v172_v54 = vadd.f32 %v574_v40, %v171_v51  ;;  %v200_v56 = vpop.f32.mrf.mxu1 }
  0xbc   :  { %442 = vmatmul.f32.vlgmr.msrb.gmra.mxu0 %v822_v52  ;;  %v324_v57 = vrot.slane %v822_v52, 1  ;;  %v299_v19 = vrot.slane %v822_v52, 7 }
  0xbd   :  { %v201_v59 = vadd.f32 %v200_v56, %v172_v54 }
  0xbf   :  { %v229_v60 = vpop.f32.mrf.mxu2 }
  0xc0   :  { %v230_v53 = vadd.f32 %v229_v60, %v201_v59 }
  0xc2   :  { %v174_v63 = vpop.f32.mrf.mxu0  ;;  %v239_v55 = vmax.f32 %v230_v53, 0.0  ;;  %v486_v53 = vld [vmem:[#allocation5 + $0x10] sm:$0xff] }
  0xc3   :  { %v175_v1 = vadd.f32 %v574_v40, %v174_v63  ;;  %v203_v3 = vpop.f32.mrf.mxu1 }
  0xc4   :  { %v325_v4 = vrot.slane %v239_v55, 1  ;;  %445 = vmatmul.f32.gmra.mxu0 %v239_v55  ;;  %v300_v22 = vrot.slane %v239_v55, 7 }
  0xc5   :  { %v204_v61 = vadd.f32 %v203_v3, %v175_v1 }
  0xc6   :  { %v331_v0 = vsel %vm328_vm0, %v324_v57, %v325_v4  ;;  %v306_v24 = vsel %vm303_vm3, %v299_v19, %v300_v22 }
  0xc7   :  { %v232_v2 = vpop.f32.mrf.mxu2  ;;  %471 = vmatmul.f32.vlgmr.msrb.gmra.mxu1 %v331_v0 }
  0xc8   :  { %v233_v6 = vadd.f32 %v232_v2, %v204_v61 }
  0xca   :  { %v177_v8 = vpop.f32.mrf.mxu0  ;;  %v240_v9 = vmax.f32 %v233_v6, 0.0 }
  0xcb   :  { %v178_v10 = vadd.f32 %v574_v40, %v177_v8  ;;  %v206_v11 = vpop.f32.mrf.mxu1  ;;  %v484_v40 = vld [vmem:[#allocation5] sm:$0xff] }
  0xcc   :  { %v326_v12 = vrot.slane %v240_v9, 1  ;;  %448 = vmatmul.f32.vlgmr.msrb.gmra.mxu2 %v240_v9  ;;  %v301_v26 = vrot.slane %v240_v9, 7 }
  0xcd   :  { %v207_v13 = vadd.f32 %v206_v11, %v178_v10 }
  0xce   :  { %v330_v14 = vsel %vm328_vm0, %v325_v4, %v326_v12  ;;  %v305_v27 = vsel %vm303_vm3, %v300_v22, %v301_v26 }
  0xcf   :  { %v235_v15 = vpop.f32.mrf.mxu2  ;;  %526 = vmatmul.msk.f32.gmra.mxu1 %vm531_vm1, %v330_v14 }
  0xd0   :  { %v236_v16 = vadd.f32 %v235_v15, %v207_v13 }
  0xd2   :  { %v241_v18 = vmax.f32 %v236_v16, 0.0 }
  0xd4   :  { %v302_v20 = vrot.slane %v241_v18, 7  ;;  %451 = vmatmul.f32.gmra.mxu2 %v241_v18  ;;  %v327_v29 = vrot.slane %v241_v18, 1 }
  0xd6   :  { %v307_v21 = vsel %vm303_vm3, %v302_v20, %v299_v19  ;;  %v304_v28 = vsel %vm303_vm3, %v301_v26, %v302_v20  ;;  %v329_v31 = vsel %vm328_vm0, %v326_v12, %v327_v29  ;;  %v332_v33 = vsel %vm328_vm0, %v327_v29, %v324_v57 }
  0xd7   :  { %522 = vmatmul.msk.f32.vlgmr.msra.gmra.mxu3 %vm529_vm2, %v307_v21 }
  0xdf   :  { %416 = vmatmul.f32.gmra.mxu3 %v306_v24 }
  0xe7   :  { %524 = vmatmul.msk.f32.gmra.mxu3 %vm530_vm4, %v305_v27 }
  0xef   :  { %422 = vmatmul.f32.gmra.mxu3 %v304_v28 }
  0xf7   :  { %477 = vmatmul.f32.vlgmr.msrb.gmra.mxu3 %v329_v31 }
  0xff   :  { %528 = vmatmul.msk.f32.gmra.mxu3 %vm532_vm5, %v332_v33 }
 0x139   :  { %v443_v35 = vpop.f32.mrf.mxu0 }
 0x141   :  { %v446_v46 = vpop.f32.mrf.mxu0 }
 0x144   :  { %v472_v38 = vpop.f32.mrf.mxu1 }
 0x14c   :  { %v475_v48 = vpop.f32.mrf.mxu1 }
 0x14f   :  { %v449_v59 = vpop.f32.mrf.mxu2 }
 0x157   :  { %v452_v57 = vpop.f32.mrf.mxu2 }
 0x15a   :  { %v414_v36 = vpop.f32.mrf.mxu3 }
 0x15b   :  { %v415_v37 = vadd.f32 %v575_v34, %v414_v36 }
 0x15d   :  { %v444_v39 = vadd.f32 %v443_v35, %v415_v37 }
 0x15f   :  { %v473_v41 = vadd.f32 %v472_v38, %v444_v39 }
 0x161   :  { %v488_v42 = vadd.f32 %v484_v40, %v473_v41 }
 0x162   :  { %v417_v43 = vpop.f32.mrf.mxu3 }
 0x163   :  { %v492_v44 = vmax.f32 %v488_v42, 0.0  ;;  %v418_v45 = vadd.f32 %v575_v34, %v417_v43 }
 0x165   :  { %496 = vst [vmem:[#allocation10] sm:$0xff] %v492_v44  ;;  %v447_v47 = vadd.f32 %v446_v46, %v418_v45 }
 0x167   :  { %v476_v50 = vadd.f32 %v475_v48, %v447_v47 }
 0x169   :  { %v489_v51 = vadd.f32 %v485_v49, %v476_v50 }
 0x16a   :  { %v420_v52 = vpop.f32.mrf.mxu3 }
 0x16b   :  { %v493_v54 = vmax.f32 %v489_v51, 0.0  ;;  %v421_v58 = vadd.f32 %v575_v34, %v420_v52 }
 0x16d   :  { %497 = vst [vmem:[#allocation10 + $0x8] sm:$0xff] %v493_v54  ;;  %v450_v60 = vadd.f32 %v449_v59, %v421_v58 }
 0x172   :  { %v423_v56 = vpop.f32.mrf.mxu3 }
 0x173   :  { %v424_v55 = vadd.f32 %v575_v34, %v423_v56 }
 0x175   :  { %v453_v4 = vadd.f32 %v452_v57, %v424_v55 }
 0x17a   :  { %v478_v62 = vpop.f32.mrf.mxu3 }
 0x17b   :  { %v479_v63 = vadd.f32 %v478_v62, %v450_v60 }
 0x17d   :  { %v490_v1 = vadd.f32 %v486_v53, %v479_v63 }
 0x17f   :  { %v494_v3 = vmax.f32 %v490_v1, 0.0 }
 0x181   :  { %498 = vst [vmem:[#allocation10 + $0x10] sm:$0xff] %v494_v3 }
 0x182   :  { %v481_v61 = vpop.f32.mrf.mxu3 }
 0x183   :  { %v482_v0 = vadd.f32 %v481_v61, %v453_v4 }
 0x185   :  { %v491_v2 = vadd.f32 %v487_v5, %v482_v0 }
 0x187   :  { %v495_v6 = vmax.f32 %v491_v2, 0.0 }
 0x189   :  { %499 = vst [vmem:[#allocation10 + $0x18] sm:$0xff] %v495_v6 }
 0x18a   :  { %512 = dma.vmem_to_hbm [thread:$0]  %s505_s20, 512, %s507_s23, [#allocation4], %s705_s29, %s705_s29, %s706_s30  }
 0x18b   :  { %702 = dma.done.wait [#allocation4], 512  }
 0x18c   :  { %703 = vsyncadd [#allocation4], 4294966784 }
 0x18d   :  { %517 = vsyncpa [#allocation3], 1 }
 0x18e   :  { %518 = vsyncpa [#allocation6], 1 }
 0x18f   :  { %519 = vsyncpa [#allocation9], 1 }
 0x190   :  { %520 = vsyncpa [#allocation4], 1 }

</bundles_post_ra>
